<compile_context>
chip_gen: v6e
topology: v6e:2x2x1
jax: 0.10.0
libtpu: 0.0.40
codegen_flags: <defaults>
</compile_context>

<pallas_src>
import functools

import jax
import jax.numpy as jnp
from jax.experimental import pallas as pl
from jax.experimental.pallas import tpu as pltpu

IN_F, HID, OUT_F = 6, 32, 1


def mlp_kernel(x_ref, w1_ref, b1_ref, w2_ref, b2_ref, w3_ref, b3_ref, o_ref):
    # x_ref: (6, BT) with batch on the lane axis.  Weights are (out, in) like
    # nn.Linear; biases are (out, 1) columns that broadcast over the lane axis.
    bf = jnp.bfloat16
    x = x_ref[...].astype(bf)                                           # (6, BT) bf16

    h1 = jnp.dot(w1_ref[...].astype(bf), x, preferred_element_type=jnp.float32)
    h1 = jnp.maximum(h1 + b1_ref[...], 0.0)                             # (32, BT) f32

    h2 = jnp.dot(w2_ref[...].astype(bf), h1.astype(bf),
                 preferred_element_type=jnp.float32)
    h2 = jnp.maximum(h2 + b2_ref[...], 0.0)                             # (32, BT) f32

    z = jnp.dot(w3_ref[...].astype(bf), h2.astype(bf),
                preferred_element_type=jnp.float32) + b3_ref[0, 0]      # (1, BT) f32

    # 248*sigmoid(z) + 8  ==  132 + 124*tanh(z/2)   (exact; single EUP op)
    o_ref[...] = 132.0 + 124.0 * jnp.tanh(0.5 * z)                      # lane-dense


@functools.partial(jax.jit, static_argnames=("block_b_max",))
def adaptive_k_net(x, params, *, block_b_max=4096):
    """x: (B, 6) float32 -> (B, 1) float32."""
    w1, b1, w2, b2, w3, b3 = params
    B = x.shape[0]
    assert block_b_max % 128 == 0

    # Tile selection: big tiles to amortize per-step overhead, but at least 2 tiles
    # for large B so the 'parallel' grid axis feeds both v7x TensorCores.
    half = -(-B // 2)
    block_b = max(128, min(block_b_max, ((half + 127) // 128) * 128))
    num_tiles = -(-B // block_b)

    # Single transpose so batch lands on the lane axis.  No zero padding: the cdiv
    # grid's partial last block covers ragged batches.
    xt = x.astype(jnp.float32).T                                        # (6, B)

    full = lambda shape: pl.BlockSpec(shape, lambda i: (0, 0))

    flops = int(2 * B * (IN_F * HID + HID * HID + HID * OUT_F) + 5 * B * HID)
    bytes_accessed = int(4 * B * (IN_F + OUT_F)
                         + 4 * (HID * IN_F + HID * HID + OUT_F * HID + 2 * HID + 1))

    out_t = pl.pallas_call(
        mlp_kernel,
        out_shape=jax.ShapeDtypeStruct((OUT_F, B), jnp.float32),
        grid_spec=pltpu.PrefetchScalarGridSpec(
            num_scalar_prefetch=0,
            grid=(num_tiles,),
            in_specs=[
                pl.BlockSpec((IN_F, block_b), lambda i: (0, i)),        # x tile
                full((HID, IN_F)), full((HID, 1)),                      # layer 1
                full((HID, HID)), full((HID, 1)),                       # layer 2
                full((OUT_F, HID)),                                     # layer 3 weight
                pl.BlockSpec(memory_space=pltpu.MemorySpace.SMEM),      # layer 3 bias
            ],
            out_specs=pl.BlockSpec((OUT_F, block_b), lambda i: (0, i)),
        ),
        compiler_params=pltpu.CompilerParams(
            dimension_semantics=("parallel",)),
        cost_estimate=pl.CostEstimate(
            flops=flops,
            transcendentals=int(B),          # one tanh per row
            bytes_accessed=bytes_accessed,
        ),
    )(xt, w1, b1, w2, b2, w3, b3)

    return out_t.T                                                      # (B, 1)


def init_params(key):
    """Deterministic init mimicking PyTorch's default Linear init
    (uniform(-1/sqrt(fan_in), 1/sqrt(fan_in))).  Weights are (out, in) like
    nn.Linear; biases are (out, 1) columns for lane-axis broadcast."""
    dims = [(IN_F, HID), (HID, HID), (HID, OUT_F)]
    params = []
    keys = jax.random.split(key, 2 * len(dims))
    for li, (fan_in, fan_out) in enumerate(dims):
        bound = 1.0 / (fan_in ** 0.5)
        w = jax.random.uniform(keys[2 * li], (fan_out, fan_in),
                               minval=-bound, maxval=bound, dtype=jnp.float32)
        b = jax.random.uniform(keys[2 * li + 1], (fan_out, 1),
                               minval=-bound, maxval=bound, dtype=jnp.float32)
        params += [w, b]
    return tuple(params)


def reference_f32(x, params):
    """Exact f32 spec (matches the PyTorch module)."""
    w1, b1, w2, b2, w3, b3 = params
    h = jnp.maximum(x @ w1.T + b1.T, 0.0)
    h = jnp.maximum(h @ w2.T + b2.T, 0.0)
    y = jax.nn.sigmoid(h @ w3.T + b3.T)
    return y * 248.0 + 8.0


def reference_bf16(x, params):
    """Mirrors the kernel arithmetic (bf16 dot operands, f32 accumulation, tanh form)."""
    w1, b1, w2, b2, w3, b3 = params
    bf = jnp.bfloat16
    h = jnp.dot(x.astype(bf), w1.T.astype(bf), preferred_element_type=jnp.float32) + b1.T
    h = jnp.maximum(h, 0.0)
    h = jnp.dot(h.astype(bf), w2.T.astype(bf), preferred_element_type=jnp.float32) + b2.T
    h = jnp.maximum(h, 0.0)
    z = jnp.dot(h.astype(bf), w3.T.astype(bf), preferred_element_type=jnp.float32) + b3.T
    return 132.0 + 124.0 * jnp.tanh(0.5 * z)


if __name__ == "__main__":
    key = jax.random.PRNGKey(0)
    kp, kx, kx2 = jax.random.split(key, 3)
    params = init_params(kp)

    # --- small single-tile batch ---
    B = 8
    x = jax.random.normal(kx, (B, IN_F), dtype=jnp.float32)
    out = jax.block_until_ready(adaptive_k_net(x, params))
    assert out.shape == (B, 1)
    # Tight check against the numerically-equivalent bf16-matmul reference.
    assert float(jnp.max(jnp.abs(out - reference_bf16(x, params)))) < 0.1
    # Loose check against the exact f32 spec: the only difference is bf16 rounding of
    # the dot operands; 1.0 abs is <0.5% of the 248-wide output range.
    assert float(jnp.max(jnp.abs(out - reference_f32(x, params)))) < 1.0
    # Output-range contract of the module: sigmoid*248 + 8 in [8, 256].
    assert bool(jnp.all(out >= 8.0 - 1e-3)) and bool(jnp.all(out <= 256.0 + 1e-3))

    # --- multi-tile + ragged last block path (3 grid steps of 128, partial tail) ---
    B2 = 300
    x2 = jax.random.normal(kx2, (B2, IN_F), dtype=jnp.float32)
    out2 = jax.block_until_ready(adaptive_k_net(x2, params, block_b_max=128))
    assert out2.shape == (B2, 1)
    assert float(jnp.max(jnp.abs(out2 - reference_bf16(x2, params)))) < 0.1

    print("KERNEL_OK")
</pallas_src>

<mosaic_0001>
module attributes {stable_mosaic.version = 11 : i64} {
  func.func @mlp_kernel(%arg0: i32, %arg1: memref<6x128xf32, #tpu.memory_space<vmem>>, %arg2: memref<32x6xf32, #tpu.memory_space<vmem>>, %arg3: memref<32x1xf32, #tpu.memory_space<vmem>>, %arg4: memref<32x32xf32, #tpu.memory_space<vmem>>, %arg5: memref<32x1xf32, #tpu.memory_space<vmem>>, %arg6: memref<1x32xf32, #tpu.memory_space<vmem>>, %arg7: memref<1x1xf32, #tpu.memory_space<smem>>, %arg8: memref<1x128xf32, #tpu.memory_space<vmem>>) attributes {dimension_semantics = [#tpu.dimension_semantics<parallel>], iteration_bounds = array<i64: 1>, scalar_prefetch = 0 : i64, scratch_operands = 0 : i64, tpu.core_type = #tpu.core_type<tc>, window_params = [{transform_indices = @transform_0, window_bounds = array<i64: 6, 128>}, {pipeline_mode = #tpu.pipeline_mode<synchronous>, transform_indices = @transform_1, window_bounds = array<i64: 32, 6>}, {pipeline_mode = #tpu.pipeline_mode<synchronous>, transform_indices = @transform_2, window_bounds = array<i64: 32, 1>}, {pipeline_mode = #tpu.pipeline_mode<synchronous>, transform_indices = @transform_3, window_bounds = array<i64: 32, 32>}, {pipeline_mode = #tpu.pipeline_mode<synchronous>, transform_indices = @transform_4, window_bounds = array<i64: 32, 1>}, {pipeline_mode = #tpu.pipeline_mode<synchronous>, transform_indices = @transform_5, window_bounds = array<i64: 1, 32>}, {transform_indices = @transform_6, window_bounds = array<i64: 1, 1>}, {transform_indices = @transform_7, window_bounds = array<i64: 1, 128>}]} {
    %c0 = arith.constant 0 : index
    %c0_0 = arith.constant 0 : index
    %0 = vector.load %arg1[%c0, %c0_0] : memref<6x128xf32, #tpu.memory_space<vmem>>, vector<6x128xf32>
    %1 = arith.truncf %0 : vector<6x128xf32> to vector<6x128xbf16>
    %c0_1 = arith.constant 0 : index
    %c0_2 = arith.constant 0 : index
    %2 = vector.load %arg2[%c0_1, %c0_2] : memref<32x6xf32, #tpu.memory_space<vmem>>, vector<32x6xf32>
    %3 = arith.truncf %2 : vector<32x6xf32> to vector<32x6xbf16>
    %cst = arith.constant dense<0.000000e+00> : vector<32x128xf32>
    %4 = tpu.matmul %3, %1, %cst {dimension_numbers = #tpu.dot_dimension_numbers<[1], [0], [0], [1], [0, 0, 1, 1], [], []>} : vector<32x6xbf16>, vector<6x128xbf16>, vector<32x128xf32> -> vector<32x128xf32>
    %c0_3 = arith.constant 0 : index
    %c0_4 = arith.constant 0 : index
    %5 = vector.load %arg3[%c0_3, %c0_4] : memref<32x1xf32, #tpu.memory_space<vmem>>, vector<32x1xf32>
    %6 = vector.broadcast %5 : vector<32x1xf32> to vector<32x128xf32>
    %7 = arith.addf %4, %6 : vector<32x128xf32>
    %cst_5 = arith.constant 0.000000e+00 : f32
    %8 = vector.broadcast %cst_5 : f32 to vector<32x128xf32>
    %9 = arith.maximumf %7, %8 : vector<32x128xf32>
    %c0_6 = arith.constant 0 : index
    %c0_7 = arith.constant 0 : index
    %10 = vector.load %arg4[%c0_6, %c0_7] : memref<32x32xf32, #tpu.memory_space<vmem>>, vector<32x32xf32>
    %11 = arith.truncf %10 : vector<32x32xf32> to vector<32x32xbf16>
    %12 = arith.truncf %9 : vector<32x128xf32> to vector<32x128xbf16>
    %cst_8 = arith.constant dense<0.000000e+00> : vector<32x128xf32>
    %13 = tpu.matmul %11, %12, %cst_8 {dimension_numbers = #tpu.dot_dimension_numbers<[1], [0], [0], [1], [0, 0, 1, 1], [], []>} : vector<32x32xbf16>, vector<32x128xbf16>, vector<32x128xf32> -> vector<32x128xf32>
    %c0_9 = arith.constant 0 : index
    %c0_10 = arith.constant 0 : index
    %14 = vector.load %arg5[%c0_9, %c0_10] : memref<32x1xf32, #tpu.memory_space<vmem>>, vector<32x1xf32>
    %15 = vector.broadcast %14 : vector<32x1xf32> to vector<32x128xf32>
    %16 = arith.addf %13, %15 : vector<32x128xf32>
    %cst_11 = arith.constant 0.000000e+00 : f32
    %17 = vector.broadcast %cst_11 : f32 to vector<32x128xf32>
    %18 = arith.maximumf %16, %17 : vector<32x128xf32>
    %c0_12 = arith.constant 0 : index
    %c0_13 = arith.constant 0 : index
    %19 = vector.load %arg6[%c0_12, %c0_13] : memref<1x32xf32, #tpu.memory_space<vmem>>, vector<1x32xf32>
    %20 = arith.truncf %19 : vector<1x32xf32> to vector<1x32xbf16>
    %21 = arith.truncf %18 : vector<32x128xf32> to vector<32x128xbf16>
    %cst_14 = arith.constant dense<0.000000e+00> : vector<1x128xf32>
    %22 = tpu.matmul %20, %21, %cst_14 {dimension_numbers = #tpu.dot_dimension_numbers<[1], [0], [0], [1], [0, 0, 1, 1], [], []>} : vector<1x32xbf16>, vector<32x128xbf16>, vector<1x128xf32> -> vector<1x128xf32>
    %c0_15 = arith.constant 0 : index
    %c0_16 = arith.constant 0 : index
    %23 = memref.load %arg7[%c0_15, %c0_16] : memref<1x1xf32, #tpu.memory_space<smem>>
    %24 = vector.broadcast %23 : f32 to vector<1x128xf32>
    %25 = arith.addf %22, %24 : vector<1x128xf32>
    %cst_17 = arith.constant 5.000000e-01 : f32
    %26 = vector.broadcast %cst_17 : f32 to vector<1x128xf32>
    %27 = arith.mulf %26, %25 : vector<1x128xf32>
    %28 = math.tanh %27 : vector<1x128xf32>
    %cst_18 = arith.constant 1.240000e+02 : f32
    %29 = vector.broadcast %cst_18 : f32 to vector<1x128xf32>
    %30 = arith.mulf %29, %28 : vector<1x128xf32>
    %cst_19 = arith.constant 1.320000e+02 : f32
    %31 = vector.broadcast %cst_19 : f32 to vector<1x128xf32>
    %32 = arith.addf %31, %30 : vector<1x128xf32>
    %c0_20 = arith.constant 0 : index
    %c0_21 = arith.constant 0 : index
    %33 = vector.load %arg8[%c0_20, %c0_21] : memref<1x128xf32, #tpu.memory_space<vmem>>, vector<1x128xf32>
    tpu.vector_store %arg8[%c0_20, %c0_21], %32 {strides = array<i32>} : memref<1x128xf32, #tpu.memory_space<vmem>>, vector<1x128xf32>,
    return
  }
  func.func @transform_0(%arg0: i32) -> (i32, i32) {
    %c0_i32 = arith.constant 0 : i32
    %c0_i32_0 = arith.constant 0 : i32
    return %c0_i32, %arg0 : i32, i32
  }
  func.func @transform_1(%arg0: i32) -> (i32, i32) {
    %c0_i32 = arith.constant 0 : i32
    %c0_i32_0 = arith.constant 0 : i32
    %c0_i32_1 = arith.constant 0 : i32
    return %c0_i32, %c0_i32_0 : i32, i32
  }
  func.func @transform_2(%arg0: i32) -> (i32, i32) {
    %c0_i32 = arith.constant 0 : i32
    %c0_i32_0 = arith.constant 0 : i32
    %c0_i32_1 = arith.constant 0 : i32
    return %c0_i32, %c0_i32_0 : i32, i32
  }
  func.func @transform_3(%arg0: i32) -> (i32, i32) {
    %c0_i32 = arith.constant 0 : i32
    %c0_i32_0 = arith.constant 0 : i32
    %c0_i32_1 = arith.constant 0 : i32
    return %c0_i32, %c0_i32_0 : i32, i32
  }
  func.func @transform_4(%arg0: i32) -> (i32, i32) {
    %c0_i32 = arith.constant 0 : i32
    %c0_i32_0 = arith.constant 0 : i32
    %c0_i32_1 = arith.constant 0 : i32
    return %c0_i32, %c0_i32_0 : i32, i32
  }
  func.func @transform_5(%arg0: i32) -> (i32, i32) {
    %c0_i32 = arith.constant 0 : i32
    %c0_i32_0 = arith.constant 0 : i32
    %c0_i32_1 = arith.constant 0 : i32
    return %c0_i32, %c0_i32_0 : i32, i32
  }
  func.func @transform_6(%arg0: i32) -> (i32, i32) {
    %c0_i32 = arith.constant 0 : i32
    %c0_i32_0 = arith.constant 0 : i32
    %c0_i32_1 = arith.constant 0 : i32
    return %c0_i32, %c0_i32_0 : i32, i32
  }
  func.func @transform_7(%arg0: i32) -> (i32, i32) {
    %c0_i32 = arith.constant 0 : i32
    %c0_i32_0 = arith.constant 0 : i32
    return %c0_i32, %arg0 : i32, i32
  }
}

</mosaic_0001>

<bundles_post_ra>
// kernel: adaptive_k_net.1
= control target key start
LH: loop header
LB: loop body
LE: loop exit
PB: predicated region body
PF: predicated region fallthrough
CT: control target
= control target key end

     0   :  { %vm68_vm0 = vcmask 1042432   ;;  %vm61_vm1 = vcmask 48128   ;;  %v353_v8 = vmov 0   ;;  %s462_s0 = inlined_call_operand.vmem [shape: f32[6,8], index: 0, kind: input, shape index: {}]   ;;  %s463_s1 = inlined_call_operand.vmem [shape: f32[32,6], index: 1, kind: input, shape index: {}]   ;;  %s464_s2 = inlined_call_operand.vmem [shape: f32[32,1], index: 2, kind: input, shape index: {}]   ;;  %s465_s3 = inlined_call_operand.vmem [shape: f32[32,32], index: 3, kind: input, shape index: {}]   ;;  %s466_s4 = inlined_call_operand.vmem [shape: f32[32,1], index: 4, kind: input, shape index: {}]   ;;  %s467_s5 = inlined_call_operand.vmem [shape: f32[1,32], index: 5, kind: input, shape index: {}]   ;;  %s468_s6 = inlined_call_operand.<no memory space> [shape: f32[1,1], index: 6, kind: input, shape index: {}]   ;;  %s469_s7 = inlined_call_operand.hbm [shape: f32[1,8], index: 7, kind: output, shape index: {}]  }
   0x1   :  { %v29_v0 = vld [vmem:[%s462_s0] sm:$0x3f]  ;;  %v32_v2 = vld [vmem:[%s463_s1 + $0x8] sm:$0xff]  ;;  %v33_v5 = vld [vmem:[%s463_s1 + $0x10] sm:$0xff]  ;;  %327 = vset.pattern.permute.xlu0 %v353_v8  ;;  %328 = vset.pattern.permute.xlu1 %v353_v8 }
   0x2   :  { %v31_v1 = vld [vmem:[%s463_s1] sm:$0xff]  ;;  %v30_v3 = vpack.c.bf16 %v29_v0, %v29_v0  ;;  %v34_v6 = vld [vmem:[%s463_s1 + $0x18] sm:$0xff]  ;;  %v39_v7 = vld [vmem:[%s464_s2 + $0x10] sm:$0xff] }
   0x3   :  { %v35_v4 = vpack.c.bf16 %v32_v2, %v31_v1  ;;  %v37_v9 = vld [vmem:[%s464_s2] sm:$0xff]  ;;  %v36_v11 = vpack.c.bf16 %v34_v6, %v33_v5  ;;  %53 = vperm.xlu0 %327, %v39_v7  }
   0x4   :  { %322 = vmatprep.subr.msk.bf16.mxu0 %vm68_vm0, %v30_v3  ;;  %v70_v10 = vsel %vm68_vm0, %v30_v3, 0 }
   0x5   :  { %302 = vmatprep.mubr.msk.bf16.mxu0 %vm61_vm1, %v35_v4  ;;  %301 = vmatpush3.bf16.msra.mxu0 %v70_v10 }
   0x6   :  { %13 = vsyncpa [#allocation4], 0  ;;  %v40_v12 = vld [vmem:[%s464_s2 + $0x18] sm:$0xff]  ;;  %43 = vperm.xlu1 %328, %v37_v9   ;;  %v38_v13 = vld [vmem:[%s464_s2 + $0x8] sm:$0xff]  ;;  %vm157_vm2 = vcmask 261120   ;;  %v354_v42 = vmov 0.0   ;;  %v222_v63 = vstv %s468_s6 }
   0x7   :  { %58 = vperm.xlu0 %327, %v40_v12   ;;  %v135_v14 = vld [vmem:[%s466_s4 + $0x10] sm:$0xff]  ;;  %v136_v15 = vld [vmem:[%s466_s4 + $0x18] sm:$0xff]  ;;  %v133_v16 = vld [vmem:[%s466_s4] sm:$0xff]  ;;  %314 = vmatprep.subr.bf16.mxu0 %v354_v42  ;;  %vm355_vm3 = vmmov 0   ;;  %s356_s0 = smov [#allocation3]  }
   0x8   :  { %303 = vmatmul.mubr.msk.bf16.vlgmr.msra.gmra.mxu0 %vm61_vm1, %v36_v11  ;;  %v134_v17 = vld [vmem:[%s466_s4 + $0x8] sm:$0xff]  ;;  %v125_v18 = vld [vmem:[%s465_s3] sm:$0xff]  ;;  %v127_v39 = vld [vmem:[%s465_s3 + $0x10] sm:$0xff] }
   0x9   :  { %v126_v19 = vld [vmem:[%s465_s3 + $0x8] sm:$0xff]  ;;  %v128_v40 = vld [vmem:[%s465_s3 + $0x18] sm:$0xff]  ;;  %318 = vmatprep.mubr.msk.bf16.mxu0 %vm355_vm3, %v354_v42  ;;  %v217_v60 = vld [vmem:[%s467_s5] sm:$0x1]  ;;  %s277_s5 = sshll.u32 %s356_s0, 4  ;;  %s278_s5 = int_to_ptr.vmem [resolvable:$true] %s277_s5 }
   0xa   :  { %48 = vperm.xlu1 %328, %v38_v13   ;;  %v129_v20 = vpack.c.bf16 %v126_v19, %v125_v18  ;;  %v130_v41 = vpack.c.bf16 %v128_v40, %v127_v39  ;;  %v218_v62 = vpack.c.bf16 %v217_v60, %v217_v60  ;;  %s331_s11 = scalar_lea.vmem %s278_s5, 16  ;;  %s335_s12 = scalar_lea.vmem %s278_s5, 32 }
   0xb   :  { %149 = vperm.xlu0 %327, %v135_v14   ;;  %p332_p0 = scmp.ne.s32.totalorder %s278_s5, %s331_s11  ;;  %p336_p1 = scmp.lt.s32.totalorder %s278_s5, %s278_s5 }
   0xc   :  { %310 = vmatprep.mubr.msk.bf16.mxu1 %vm157_vm2, %v129_v20  ;;  %p337_p2 = scmp.lt.s32.totalorder %s335_s12, %s331_s11 }
   0xe   :  { %154 = vperm.xlu1 %328, %v136_v15   ;;  %p338_p3 = por %p337_p2, %p336_p1 }
   0xf   :  { %139 = vperm.xlu0 %327, %v133_v16  }
  0x10   :  { %p339_p4 = pnand %p338_p3, %p332_p0 }
  0x12   :  { %144 = vperm.xlu1 %328, %v134_v17  }
  0x7e   :  { %v54_v21 = vpop.permute.xlu0 %53 }
  0x81   :  { %v44_v22 = vpop.permute.xlu1 %43 }
  0x82   :  { %v59_v26 = vpop.permute.xlu0 %58 }
  0x85   :  { %v49_v30 = vpop.permute.xlu1 %48 }
  0x86   :  { %v150_v43 = vpop.permute.xlu0 %149 }
  0x89   :  { %v155_v44 = vpop.permute.xlu1 %154 }
  0x8a   :  { %v140_v49 = vpop.permute.xlu0 %139 }
  0x8d   :  { %v145_v51 = vpop.permute.xlu1 %144 }
  0xc8   :  { %v304_v23 = vpop.f32.mrf.mxu0 }
  0xc9   :  { %v115_v25 = vadd.f32 %v304_v23, %v54_v21 }
  0xca   :  { %v106_v24 = vpop.f32.mrf.mxu0 }
  0xcb   :  { %v107_v28 = vadd.f32 %v106_v24, %v44_v22  ;;  %v123_v32 = vmax.f32 %v115_v25, 0.0 }
  0xcc   :  { %v305_v27 = vpop.f32.mrf.mxu0 }
  0xcd   :  { %v118_v29 = vadd.f32 %v305_v27, %v59_v26  ;;  %v121_v35 = vmax.f32 %v107_v28, 0.0 }
  0xce   :  { %v109_v31 = vpop.f32.mrf.mxu0 }
  0xcf   :  { %v124_v33 = vmax.f32 %v118_v29, 0.0  ;;  %v110_v34 = vadd.f32 %v109_v31, %v49_v30 }
  0xd1   :  { %v122_v36 = vmax.f32 %v110_v34, 0.0  ;;  %v132_v37 = vpack.c.bf16 %v124_v33, %v123_v32 }
  0xd3   :  { %v131_v38 = vpack.c.bf16 %v122_v36, %v121_v35  ;;  %306 = vmatprep.subr.bf16.mxu1 %v132_v37 }
  0xd4   :  { %307 = vmatpush3.bf16.msra.mxu1 %v132_v37 }
  0xd5   :  { %308 = vmatprep.subr.bf16.mxu1 %v131_v38 }
  0xd8   :  { %309 = vmatpush3.bf16.msra.mxu1 %v131_v38 }
  0xdb   :  { %311 = vmatmul.mubr.msk.bf16.vlgmr.msra.gmra.mxu1 %vm157_vm2, %v130_v41 }
 0x19b   :  { %v312_v45 = vpop.f32.mrf.mxu1 }
 0x19c   :  { %v207_v47 = vadd.f32 %v312_v45, %v150_v43 }
 0x19d   :  { %v198_v46 = vpop.f32.mrf.mxu1 }
 0x19e   :  { %v215_v53 = vmax.f32 %v207_v47, 0.0  ;;  %v199_v54 = vadd.f32 %v198_v46, %v140_v49 }
 0x19f   :  { %v313_v48 = vpop.f32.mrf.mxu1 }
 0x1a0   :  { %v210_v50 = vadd.f32 %v313_v48, %v155_v44  ;;  %v213_v59 = vmax.f32 %v199_v54, 0.0 }
 0x1a1   :  { %v201_v52 = vpop.f32.mrf.mxu1 }
 0x1a2   :  { %v216_v55 = vmax.f32 %v210_v50, 0.0  ;;  %v202_v56 = vadd.f32 %v201_v52, %v145_v51 }
 0x1a4   :  { %v220_v57 = vpack.c.bf16 %v216_v55, %v215_v53  ;;  %v214_v58 = vmax.f32 %v202_v56, 0.0 }
 0x1a6   :  { %315 = vmatpush3.bf16.msra.mxu0 %v220_v57  ;;  %v219_v61 = vpack.c.bf16 %v214_v58, %v213_v59 }
 0x1a7   :  { %316 = vmatprep.subr.bf16.mxu0 %v354_v42 }
 0x1aa   :  { %317 = vmatpush3.bf16.msra.mxu0 %v219_v61 }
 0x1ad   :  { %319 = vmatmul.mubr.msk.bf16.vlgmr.msra.gmra.mxu0 %vm157_vm2, %v218_v62 }
 0x26d   :  { %v260_v0 = vpop.f32.mrf.mxu0 }
 0x26e   :  { %v261_v1 = vadd.f32 %v260_v0, %v222_v63 }
 0x26f   :  { %v320_v2 = vpop.f32.mrf.mxu0 }
 0x270   :  { %v266_v3 = vmul.f32 0.5, %v261_v1 }
 0x271   :  { %v263_v4 = vpop.f32.mrf.mxu0 }
 0x272   :  { %329 = vtanh.f32 %v266_v3 }
 0x273   :  { %v321_v5 = vpop.f32.mrf.mxu0 }
 0x27f   :  { %v330_v6 = vpop.eup %329 }
 0x280   :  { %v268_v7 = vmul.f32 124.0, %v330_v6 }
 0x282   :  { %v269_v8 = vadd.f32 132.0, %v268_v7 }
 0x284   :  { %270 = vst [vmem:[#allocation3] sm:$0x1] %v269_v8 }
 0x285   :  { %342 = shalt.err (!%p339_p4)
}
 0x286   :  { %280 = dma.vmem_to_hbm [thread:$0]  %s278_s5, 16, %s469_s7, [#allocation4]  }
 0x287   :  { %351 = dma.done.wait [#allocation4], 16  }
 0x288   :  { %352 = vsyncadd [#allocation4], 4294967280 }
 0x289   :  { %284 = vsyncpa [#allocation4], 1 }

</bundles_post_ra>
